<compile_context>
chip_gen: v5e
topology: v5e:2x2
jax: 0.10.0
libtpu: 0.0.40
codegen_flags: <defaults>
</compile_context>

<pallas_src>
import jax
import jax.numpy as jnp
from jax.experimental import pallas as pl
from jax.experimental.pallas import tpu as pltpu  # noqa: F401  (TPU backend)

EPS = 1e-5


def _bn_kernel(x_ref, gb_ref, o_ref):
    # x_ref: (C, NHW)  ; gb_ref: (C, 2) with [:,0]=gamma, [:,1]=beta
    x = x_ref[...].astype(jnp.float32)                     # (C, NHW)
    nhw = x.shape[1]                                       # static python int
    inv_count = 1.0 / float(nhw)

    # Two-pass stats (numerically safe): mean, then centered variance.
    mean = jnp.sum(x, axis=1, keepdims=True) * inv_count   # (C, 1)
    xc = x - mean                                          # (C, NHW)
    var = jnp.sum(xc * xc, axis=1, keepdims=True) * inv_count
    inv_std = jax.lax.rsqrt(var + EPS)                     # (C, 1)

    gb = gb_ref[...].astype(jnp.float32)                   # (C, 2)
    scale = inv_std * gb[:, 0:1]                           # (C, 1)
    beta = gb[:, 1:2]                                      # (C, 1)

    # 2 VALU ops per element on the centered tile.
    o_ref[...] = (xc * scale + beta).astype(o_ref.dtype)


def batchnorm2d(x_nchw, gamma, beta):
    """BatchNorm2d forward using batch statistics (PyTorch training-mode math).

    x_nchw: (N, C, H, W)
    gamma, beta: (C,)
    returns: (N, C, H, W), same dtype as input.
    """
    N, C, H, W = x_nchw.shape
    NHW = N * H * W

    if N == 1:
        x2 = x_nchw.reshape(C, H * W)                      # free view (contiguous)
    else:
        # Per-channel stats need all N*H*W samples contiguous per channel.
        x2 = jnp.moveaxis(x_nchw, 1, 0).reshape(C, NHW)

    # Pack affine params -> one small DMA instead of two.
    gb = jnp.stack([gamma.astype(x_nchw.dtype), beta.astype(x_nchw.dtype)], axis=1)  # (C, 2)

    out2 = pl.pallas_call(
        _bn_kernel,
        out_shape=jax.ShapeDtypeStruct((C, NHW), x_nchw.dtype),
        in_specs=[
            pl.BlockSpec((C, NHW), lambda: (0, 0)),
            pl.BlockSpec((C, 2), lambda: (0, 0)),
        ],
        out_specs=pl.BlockSpec((C, NHW), lambda: (0, 0)),
    )(x2, gb)

    if N == 1:
        return out2.reshape(N, C, H, W)
    return jnp.moveaxis(out2.reshape(C, N, H, W), 0, 1)


def reference_bn(x_nchw, gamma, beta):
    mean = jnp.mean(x_nchw, axis=(0, 2, 3), keepdims=True)
    var = jnp.mean((x_nchw - mean) ** 2, axis=(0, 2, 3), keepdims=True)
    return (x_nchw - mean) / jnp.sqrt(var + EPS) * gamma.reshape(1, -1, 1, 1) \
        + beta.reshape(1, -1, 1, 1)


if __name__ == "__main__":
    key = jax.random.PRNGKey(0)
    N, C, H, W = 1, 96, 14, 14  # matches BatchNorm2d(96) on x129 of shape (1, 96, 14, 14)
    kx, kg, kb = jax.random.split(key, 3)
    x = jax.random.normal(kx, (N, C, H, W), dtype=jnp.float32)

    # PyTorch BatchNorm2d default init: weight = 1, bias = 0.
    gamma = jnp.ones((C,), dtype=jnp.float32)
    beta = jnp.zeros((C,), dtype=jnp.float32)

    out = jax.block_until_ready(batchnorm2d(x, gamma, beta))
    ref = reference_bn(x, gamma, beta)
    assert out.shape == (N, C, H, W)
    assert jnp.allclose(out, ref, atol=1e-4, rtol=1e-4), "mismatch vs reference (default affine)"

    # Extra robustness check with non-trivial affine params.
    gamma2 = jax.random.normal(kg, (C,), dtype=jnp.float32)
    beta2 = jax.random.normal(kb, (C,), dtype=jnp.float32)
    out2 = jax.block_until_ready(batchnorm2d(x, gamma2, beta2))
    ref2 = reference_bn(x, gamma2, beta2)
    assert jnp.allclose(out2, ref2, atol=1e-4, rtol=1e-4), "mismatch vs reference (random affine)"

    print("KERNEL_OK")
</pallas_src>

<mosaic_0001>
module attributes {stable_mosaic.version = 11 : i64} {
  func.func @_bn_kernel(%arg0: memref<96x196xf32, #tpu.memory_space<vmem>>, %arg1: memref<96x2xf32, #tpu.memory_space<vmem>>, %arg2: memref<96x196xf32, #tpu.memory_space<vmem>>) attributes {dimension_semantics = [], scalar_prefetch = 0 : i64, scratch_operands = 0 : i64, tpu.core_type = #tpu.core_type<tc>} {
    %c0 = arith.constant 0 : index
    %c0_0 = arith.constant 0 : index
    %0 = vector.load %arg0[%c0, %c0_0] : memref<96x196xf32, #tpu.memory_space<vmem>>, vector<96x196xf32>
    %cst = arith.constant dense<0.000000e+00> : vector<96xf32>
    %1 = vector.multi_reduction <add>, %0, %cst [1] : vector<96x196xf32> to vector<96xf32>
    %2 = vector.shape_cast %1 : vector<96xf32> to vector<96x1xf32>
    %cst_1 = arith.constant 0.00510204071 : f32
    %3 = vector.broadcast %cst_1 : f32 to vector<96x1xf32>
    %4 = arith.mulf %2, %3 : vector<96x1xf32>
    %5 = vector.broadcast %4 : vector<96x1xf32> to vector<96x196xf32>
    %6 = arith.subf %0, %5 : vector<96x196xf32>
    %7 = arith.mulf %6, %6 : vector<96x196xf32>
    %cst_2 = arith.constant dense<0.000000e+00> : vector<96xf32>
    %8 = vector.multi_reduction <add>, %7, %cst_2 [1] : vector<96x196xf32> to vector<96xf32>
    %9 = vector.shape_cast %8 : vector<96xf32> to vector<96x1xf32>
    %cst_3 = arith.constant 0.00510204071 : f32
    %10 = vector.broadcast %cst_3 : f32 to vector<96x1xf32>
    %11 = arith.mulf %9, %10 : vector<96x1xf32>
    %cst_4 = arith.constant 9.99999974E-6 : f32
    %12 = vector.broadcast %cst_4 : f32 to vector<96x1xf32>
    %13 = arith.addf %11, %12 : vector<96x1xf32>
    %14 = math.rsqrt %13 : vector<96x1xf32>
    %c0_5 = arith.constant 0 : index
    %c0_6 = arith.constant 0 : index
    %15 = vector.load %arg1[%c0_5, %c0_6] : memref<96x2xf32, #tpu.memory_space<vmem>>, vector<96x2xf32>
    %16 = vector.extract_strided_slice %15 {offsets = [0, 0], sizes = [96, 1], strides = [1, 1]} : vector<96x2xf32> to vector<96x1xf32>
    %17 = arith.mulf %14, %16 : vector<96x1xf32>
    %18 = vector.extract_strided_slice %15 {offsets = [0, 1], sizes = [96, 1], strides = [1, 1]} : vector<96x2xf32> to vector<96x1xf32>
    %19 = vector.broadcast %17 : vector<96x1xf32> to vector<96x196xf32>
    %20 = arith.mulf %6, %19 : vector<96x196xf32>
    %21 = vector.broadcast %18 : vector<96x1xf32> to vector<96x196xf32>
    %22 = arith.addf %20, %21 : vector<96x196xf32>
    %c0_7 = arith.constant 0 : index
    %c0_8 = arith.constant 0 : index
    %23 = vector.load %arg2[%c0_7, %c0_8] : memref<96x196xf32, #tpu.memory_space<vmem>>, vector<96x196xf32>
    tpu.vector_store %arg2[%c0_7, %c0_8], %22 {strides = array<i32>} : memref<96x196xf32, #tpu.memory_space<vmem>>, vector<96x196xf32>,
    return
  }
}

</mosaic_0001>

<bundles_post_ra>
// kernel: tpu_custom_call.1
= control target key start
LH: loop header
LB: loop body
LE: loop exit
PB: predicated region body
PF: predicated region fallthrough
CT: control target
= control target key end

     0   :  { %7 = vsyncpa [#allocation3], 0  ;;  %s1232_s0 = inlined_call_operand.hbm [shape: f32[96,196], index: 0, kind: input, shape index: {}]   ;;  %s1233_s1 = inlined_call_operand.vmem [shape: f32[96,2], index: 1, kind: input, shape index: {}]   ;;  %s1234_s2 = inlined_call_operand.hbm [shape: f32[96,196], index: 2, kind: output, shape index: {}]  }
   0x1   :  { %8 = vsyncpa [#allocation4], 0  ;;  %s13_s11 = sshll.u32 %s1232_s0, 4  ;;  %s679_s12 = smov [#allocation2]   ;;  %s14_s11 = int_to_ptr.hbm [resolvable:$true] %s13_s11 }
   0x2   :  { %s15_s13 = sshll.u32 %s679_s12, 4  ;;  %s680_s14 = smov 256   ;;  %s16_s13 = int_to_ptr.vmem [resolvable:$true] %s15_s13 }
   0x3   :  { %s681_s15 = smov 16  }
   0x4   :  { %21 = dma.hbm_to_vmem [thread:$0]  %s14_s11, 3072, %s16_s13, [#allocation3], %s680_s14, %s680_s14, %s681_s15  }
   0x5   :  { %675 = dma.done.wait [#allocation3], 3072  }
   0x6   :  { %676 = vsyncadd [#allocation3], 4294964224  ;;  %vm52_vm0 = vcmask 556032   ;;  %v1235_v0 = vmov 1   ;;  %v709_v1 = vld [vmem:[#allocation2 + $0x20] sm:$0xff]  ;;  %v711_v2 = vld [vmem:[#allocation2 + $0x28] sm:$0xff] }
   0x7   :  { %594 = vset.pattern.permute.xlu1 %v1235_v0  ;;  %596 = vset.pattern.permute.xlu2 %v1235_v0  ;;  %v713_v3 = vld [vmem:[#allocation2] sm:$0xff]  ;;  %v61_v4 = vsel %vm52_vm0, %v711_v2, 0.0  ;;  %v717_v5 = vld [vmem:[#allocation2 + $0x8] sm:$0xff]  ;;  %v728_v11 = vld [vmem:[#allocation2 + $0x38] sm:$0xff]  ;;  %s575_s0 = sshll.u32 %s1234_s2, 4  ;;  %s576_s0 = int_to_ptr.hbm [resolvable:$true] %s575_s0 }
   0x8   :  { %595 = vset.pattern.permute.xlu0 %v1235_v0  ;;  %v719_v6 = vld [vmem:[#allocation2 + $0x40] sm:$0xff]  ;;  %v721_v7 = vld [vmem:[#allocation2 + $0x48] sm:$0xff]  ;;  %v62_v8 = vadd.f32 %v61_v4, %v709_v1  ;;  %v53_v9 = vsel %vm52_vm0, %v717_v5, 0.0  ;;  %v732_v14 = vld [vmem:[#allocation2 + $0x18] sm:$0xff]  ;;  %v65_v17 = vsel %vm52_vm0, %v728_v11, 0.0 }
   0x9   :  { %v69_v10 = vsel %vm52_vm0, %v721_v7, 0.0  ;;  %v54_v12 = vadd.f32 %v53_v9, %v713_v3  ;;  %v734_v15 = vld [vmem:[#allocation2 + $0x58] sm:$0xff]  ;;  %v736_v16 = vld [vmem:[#allocation2 + $0x30] sm:$0xff]  ;;  %v57_v19 = vsel %vm52_vm0, %v732_v14, 0.0  ;;  %v753_v26 = vld [vmem:[#allocation2 + $0x68] sm:$0xff] }
   0xa   :  { %v70_v13 = vadd.f32 %v69_v10, %v719_v6  ;;  %63 = vadd.xlane.f32.xlu1 %v62_v8  ;;  %v740_v18 = vld [vmem:[#allocation2 + $0x10] sm:$0xff]  ;;  %v73_v21 = vsel %vm52_vm0, %v734_v15, 0.0  ;;  %v66_v22 = vadd.f32 %v65_v17, %v736_v16  ;;  %v751_v25 = vld [vmem:[#allocation2 + $0x78] sm:$0xff]  ;;  %v755_v27 = vld [vmem:[#allocation2 + $0x88] sm:$0xff]  ;;  %v77_v31 = vsel %vm52_vm0, %v753_v26, 0.0 }
   0xb   :  { %55 = vadd.xlane.f32.xlu0 %v54_v12  ;;  %v744_v20 = vld [vmem:[#allocation2 + $0x50] sm:$0xff]  ;;  %v58_v23 = vadd.f32 %v57_v19, %v740_v18  ;;  %v81_v29 = vsel %vm52_vm0, %v751_v25, 0.0  ;;  %v761_v30 = vld [vmem:[#allocation2 + $0x60] sm:$0xff]  ;;  %v85_v33 = vsel %vm52_vm0, %v755_v27, 0.0  ;;  %v772_v37 = vld [vmem:[#allocation2 + $0xa8] sm:$0xff] }
   0xc   :  { %71 = vadd.xlane.f32.xlu2 %v70_v13  ;;  %v74_v24 = vadd.f32 %v73_v21, %v744_v20  ;;  %v757_v28 = vld [vmem:[#allocation2 + $0x70] sm:$0xff]  ;;  %v765_v32 = vld [vmem:[#allocation2 + $0x80] sm:$0xff]  ;;  %v78_v35 = vadd.f32 %v77_v31, %v761_v30  ;;  %v774_v38 = vld [vmem:[#allocation2 + $0x98] sm:$0xff]  ;;  %v93_v41 = vsel %vm52_vm0, %v772_v37, 0.0 }
   0xd   :  { %v82_v34 = vadd.f32 %v81_v29, %v757_v28  ;;  %v86_v36 = vadd.f32 %v85_v33, %v765_v32  ;;  %v776_v39 = vld [vmem:[#allocation2 + $0xb8] sm:$0xff]  ;;  %v778_v40 = vld [vmem:[#allocation2 + $0xa0] sm:$0xff]  ;;  %v782_v42 = vld [vmem:[#allocation2 + $0x90] sm:$0xff]  ;;  %v89_v43 = vsel %vm52_vm0, %v774_v38, 0.0 }
   0xe   :  { %v786_v44 = vld [vmem:[#allocation2 + $0xb0] sm:$0xff]  ;;  %v97_v45 = vsel %vm52_vm0, %v776_v39, 0.0  ;;  %v94_v46 = vadd.f32 %v93_v41, %v778_v40  ;;  %v90_v47 = vadd.f32 %v89_v43, %v782_v42  ;;  %v796_v49 = vld [vmem:[%s1233_s1 + $0x8] sm:$0xff]  ;;  %v802_v50 = vld [vmem:[%s1233_s1] sm:$0xff] }
   0xf   :  { %v98_v48 = vadd.f32 %v97_v45, %v786_v44  ;;  %v807_v51 = vld [vmem:[%s1233_s1 + $0x10] sm:$0xff]  ;;  %v820_v53 = vld [vmem:[%s1233_s1 + $0x18] sm:$0xff]  ;;  %v825_v54 = vld [vmem:[%s1233_s1 + $0x20] sm:$0xff] }
  0x10   :  { %v814_v52 = vld [vmem:[%s1233_s1 + $0x30] sm:$0xff]  ;;  %v832_v55 = vld [vmem:[%s1233_s1 + $0x28] sm:$0xff]  ;;  %v837_v56 = vld [vmem:[%s1233_s1 + $0x38] sm:$0xff] }
  0x11   :  { %v844_v57 = vld [vmem:[%s1233_s1 + $0x40] sm:$0xff] }
  0x12   :  { %67 = vadd.xlane.f32.xlu1 %v66_v22 }
  0x13   :  { %59 = vadd.xlane.f32.xlu0 %v58_v23 }
  0x14   :  { %75 = vadd.xlane.f32.xlu2 %v74_v24 }
  0x1a   :  { %83 = vadd.xlane.f32.xlu1 %v82_v34 }
  0x1b   :  { %79 = vadd.xlane.f32.xlu0 %v78_v35 }
  0x1c   :  { %87 = vadd.xlane.f32.xlu2 %v86_v36 }
  0x22   :  { %95 = vadd.xlane.f32.xlu1 %v94_v46 }
  0x23   :  { %91 = vadd.xlane.f32.xlu0 %v90_v47 }
  0x24   :  { %99 = vadd.xlane.f32.xlu2 %v98_v48 }
  0x37   :  { %468 = vperm.xlu0 %595, %v796_v49  }
  0x3b   :  { %463 = vperm.xlu1 %594, %v802_v50  }
  0x3c   :  { %473 = vperm.xlu2 %596, %v807_v51  }
  0x3f   :  { %493 = vperm.xlu0 %595, %v814_v52  }
  0x43   :  { %478 = vperm.xlu1 %594, %v820_v53  }
  0x44   :  { %483 = vperm.xlu2 %596, %v825_v54  }
  0x4b   :  { %488 = vperm.xlu1 %594, %v832_v55  }
  0x4c   :  { %498 = vperm.xlu2 %596, %v837_v56  }
  0x53   :  { %503 = vperm.xlu1 %594, %v844_v57  }
  0x7d   :  { %v64_v58 = vpop.xlane.xlu1 %63 }
  0x7e   :  { %v103_v59 = vmul.f32 0.0051020407, %v64_v58  ;;  %v56_v60 = vpop.xlane.xlu0 %55 }
  0x7f   :  { %v72_v61 = vpop.xlane.xlu2 %71  ;;  %v101_v62 = vmul.f32 0.0051020407, %v56_v60 }
  0x80   :  { %v848_v63 = vsub.f32 %v709_v1, %v103_v59  ;;  %v851_v4 = vsub.f32 %v711_v2, %v103_v59  ;;  %v105_v2 = vmul.f32 0.0051020407, %v72_v61 }
  0x81   :  { %v854_v8 = vsub.f32 %v713_v3, %v101_v62  ;;  %v857_v9 = vsub.f32 %v717_v5, %v101_v62 }
  0x82   :  { %v141_v10 = vmul.f32 %v848_v63, %v848_v63  ;;  %v142_v12 = vmul.f32 %v851_v4, %v851_v4  ;;  %v870_v33 = vsub.f32 %v721_v7, %v105_v2 }
  0x83   :  { %v137_v13 = vmul.f32 %v854_v8, %v854_v8  ;;  %v138_v1 = vmul.f32 %v857_v9, %v857_v9 }
  0x84   :  { %v169_v17 = vsel %vm52_vm0, %v142_v12, 0.0  ;;  %v146_v47 = vmul.f32 %v870_v33, %v870_v33 }
  0x85   :  { %v68_v3 = vpop.xlane.xlu1 %67  ;;  %v170_v19 = vadd.f32 %v169_v17, %v141_v10  ;;  %v161_v5 = vsel %vm52_vm0, %v138_v1, 0.0 }
  0x86   :  { %v104_v21 = vmul.f32 0.0051020407, %v68_v3  ;;  %v60_v22 = vpop.xlane.xlu0 %59  ;;  %v162_v23 = vadd.f32 %v161_v5, %v137_v13  ;;  %v177_v3 = vsel %vm52_vm0, %v146_v47, 0.0 }
  0x87   :  { %v76_v24 = vpop.xlane.xlu2 %75  ;;  %v102_v29 = vmul.f32 0.0051020407, %v60_v22  ;;  %171 = vadd.xlane.f32.xlu2 %v170_v19 }
  0x88   :  { %v106_v31 = vmul.f32 0.0051020407, %v76_v24  ;;  %v873_v34 = vsub.f32 %v736_v16, %v104_v21  ;;  %v876_v35 = vsub.f32 %v728_v11, %v104_v21  ;;  %163 = vadd.xlane.f32.xlu0 %v162_v23 }
  0x89   :  { %v879_v36 = vsub.f32 %v740_v18, %v102_v29  ;;  %v882_v41 = vsub.f32 %v732_v14, %v102_v29 }
  0x8a   :  { %v885_v43 = vsub.f32 %v744_v20, %v106_v31  ;;  %v888_v45 = vsub.f32 %v734_v15, %v106_v31  ;;  %v143_v7 = vmul.f32 %v873_v34, %v873_v34  ;;  %v144_v11 = vmul.f32 %v876_v35, %v876_v35 }
  0x8b   :  { %v139_v16 = vmul.f32 %v879_v36, %v879_v36  ;;  %v140_v18 = vmul.f32 %v882_v41, %v882_v41  ;;  %v903_v15 = vsub.f32 %v719_v6, %v105_v2 }
  0x8c   :  { %v147_v14 = vmul.f32 %v885_v43, %v885_v43  ;;  %v148_v20 = vmul.f32 %v888_v45, %v888_v45  ;;  %v173_v46 = vsel %vm52_vm0, %v144_v11, 0.0 }
  0x8d   :  { %v174_v48 = vadd.f32 %v173_v46, %v143_v7  ;;  %v165_v58 = vsel %vm52_vm0, %v140_v18, 0.0  ;;  %v84_v59 = vpop.xlane.xlu1 %83  ;;  %v145_v2 = vmul.f32 %v903_v15, %v903_v15 }
  0x8e   :  { %v181_v60 = vsel %vm52_vm0, %v148_v20, 0.0  ;;  %v80_v61 = vpop.xlane.xlu0 %79  ;;  %v166_v62 = vadd.f32 %v165_v58, %v139_v16  ;;  %v108_v10 = vmul.f32 0.0051020407, %v84_v59 }
  0x8f   :  { %v88_v12 = vpop.xlane.xlu2 %87  ;;  %v182_v13 = vadd.f32 %v181_v60, %v147_v14  ;;  %v107_v1 = vmul.f32 0.0051020407, %v80_v61 }
  0x90   :  { %v109_v17 = vmul.f32 0.0051020407, %v88_v12  ;;  %175 = vadd.xlane.f32.xlu0 %v174_v48  ;;  %167 = vadd.xlane.f32.xlu1 %v166_v62  ;;  %v911_v6 = vsub.f32 %v751_v25, %v108_v10  ;;  %v937_v24 = vsub.f32 %v757_v28, %v108_v10 }
  0x91   :  { %v917_v19 = vsub.f32 %v761_v30, %v107_v1  ;;  %v920_v5 = vsub.f32 %v753_v26, %v107_v1  ;;  %183 = vadd.xlane.f32.xlu2 %v182_v13 }
  0x92   :  { %v923_v21 = vsub.f32 %v765_v32, %v109_v17  ;;  %v926_v22 = vsub.f32 %v755_v27, %v109_v17  ;;  %v178_v32 = vadd.f32 %v177_v3, %v145_v2  ;;  %v152_v27 = vmul.f32 %v911_v6, %v911_v6 }
  0x93   :  { %1247 = vst [vmem:[#allocation8_spill] sm:$0xff] %v917_v19  ;;  %v149_v25 = vmul.f32 %v917_v19, %v917_v19  ;;  %v150_v23 = vmul.f32 %v920_v5, %v920_v5  ;;  %v151_v48 = vmul.f32 %v937_v24, %v937_v24 }
  0x94   :  { %1248 = vst [vmem:[#allocation9_spill] sm:$0xff] %v920_v5  ;;  %v153_v30 = vmul.f32 %v923_v21, %v923_v21  ;;  %v154_v26 = vmul.f32 %v926_v22, %v926_v22  ;;  %v189_v58 = vsel %vm52_vm0, %v152_v27, 0.0 }
  0x95   :  { %v185_v29 = vsel %vm52_vm0, %v150_v23, 0.0  ;;  %v96_v31 = vpop.xlane.xlu1 %95 }
  0x96   :  { %v193_v7 = vsel %vm52_vm0, %v154_v26, 0.0  ;;  %v92_v11 = vpop.xlane.xlu0 %91  ;;  %v186_v16 = vadd.f32 %v185_v29, %v149_v25  ;;  %v111_v18 = vmul.f32 0.0051020407, %v96_v31 }
  0x97   :  { %v100_v14 = vpop.xlane.xlu2 %99  ;;  %v194_v20 = vadd.f32 %v193_v7, %v153_v30  ;;  %v110_v46 = vmul.f32 0.0051020407, %v92_v11  ;;  %v683_v11 = vmov 0  }
  0x98   :  { %v112_v47 = vmul.f32 0.0051020407, %v100_v14  ;;  %179 = vadd.xlane.f32.xlu1 %v178_v32  ;;  %187 = vadd.xlane.f32.xlu0 %v186_v16  ;;  %v944_v28 = vsub.f32 %v772_v37, %v111_v18  ;;  %v970_v12 = vsub.f32 %v778_v40, %v111_v18 }
  0x99   :  { %v950_v59 = vsub.f32 %v782_v42, %v110_v46  ;;  %v953_v60 = vsub.f32 %v774_v38, %v110_v46  ;;  %195 = vadd.xlane.f32.xlu2 %v194_v20  ;;  %597 = vset.pattern.permute.xlu0 %v683_v11 }
  0x9a   :  { %1249 = vst [vmem:[#allocation10_spill] sm:$0xff] %v944_v28  ;;  %v956_v61 = vsub.f32 %v786_v44, %v112_v47  ;;  %v959_v62 = vsub.f32 %v776_v39, %v112_v47  ;;  %v190_v44 = vadd.f32 %v189_v58, %v151_v48  ;;  %v158_v1 = vmul.f32 %v944_v28, %v944_v28 }
  0x9b   :  { %1250 = vst [vmem:[#allocation11_spill] sm:$0xff] %v950_v59  ;;  %v155_v37 = vmul.f32 %v950_v59, %v950_v59  ;;  %v156_v10 = vmul.f32 %v953_v60, %v953_v60  ;;  %v157_v3 = vmul.f32 %v970_v12, %v970_v12  ;;  %599 = vset.pattern.permute.xlu2 %v683_v11 }
  0x9c   :  { %1251 = vst [vmem:[#allocation12_spill] sm:$0xff] %v953_v60  ;;  %v159_v42 = vmul.f32 %v956_v61, %v956_v61  ;;  %v160_v38 = vmul.f32 %v959_v62, %v959_v62  ;;  %v201_v25 = vsel %vm52_vm0, %v158_v1, 0.0  ;;  %598 = vset.pattern.permute.xlu1 %v683_v11 }
  0x9d   :  { %1252 = vst [vmem:[#allocation13_spill] sm:$0xff] %v956_v61  ;;  %v197_v39 = vsel %vm52_vm0, %v156_v10, 0.0  ;;  %v202_v40 = vadd.f32 %v201_v25, %v157_v3 }
  0x9e   :  { %1253 = vst [vmem:[#allocation14_spill] sm:$0xff] %v959_v62  ;;  %v205_v13 = vsel %vm52_vm0, %v160_v38, 0.0  ;;  %v198_v17 = vadd.f32 %v197_v39, %v155_v37 }
  0x9f   :  { %1254 = vst [vmem:[#allocation15_spill] sm:$0xff] %v970_v12  ;;  %v206_v2 = vadd.f32 %v205_v13, %v159_v42  ;;  %v981_v30 = vpop.permute.xlu2 %473 }
  0xa0   :  { %191 = vadd.xlane.f32.xlu1 %v190_v44  ;;  %199 = vadd.xlane.f32.xlu0 %v198_v17 }
  0xa1   :  { %207 = vadd.xlane.f32.xlu2 %v206_v2 }
  0xa7   :  { %v985_v32 = vpop.permute.xlu2 %483 }
  0xa8   :  { %203 = vadd.xlane.f32.xlu1 %v202_v40 }
  0xa9   :  { %v987_v27 = vpop.permute.xlu0 %468 }
  0xad   :  { %v979_v23 = vpop.permute.xlu1 %463 }
  0xaf   :  { %v991_v31 = vpop.permute.xlu2 %498 }
  0xb0   :  { %1255 = vst [vmem:[#allocation16_spill] sm:$0xff] %v991_v31 }
  0xb1   :  { %v993_v7 = vpop.permute.xlu0 %493 }
  0xb2   :  { %1256 = vst [vmem:[#allocation17_spill] sm:$0xff] %v993_v7 }
  0xb5   :  { %v983_v26 = vpop.permute.xlu1 %478 }
  0xbd   :  { %v989_v29 = vpop.permute.xlu1 %488 }
  0xc5   :  { %v995_v18 = vpop.permute.xlu1 %503 }
  0xfa   :  { %v172_v16 = vpop.xlane.xlu2 %171 }
  0xfb   :  { %v211_v14 = vmul.f32 0.0051020407, %v172_v16  ;;  %v164_v20 = vpop.xlane.xlu0 %163 }
  0xfc   :  { %v209_v46 = vmul.f32 0.0051020407, %v164_v20 }
  0xfd   :  { %v223_v47 = vadd.f32 1e-05, %v211_v14 }
  0xfe   :  { %v221_v48 = vadd.f32 1e-05, %v209_v46 }
  0xff   :  { %603 = vrsqrt.f32 %v223_v47  ;;  %vm259_vm1 = vweird.f32 %v223_v47 }
 0x100   :  { %605 = vrsqrt.f32 %v221_v48  ;;  %vm239_vm5 = vweird.f32 %v221_v48 }
 0x103   :  { %v168_v58 = vpop.xlane.xlu1 %167  ;;  %v176_v37 = vpop.xlane.xlu0 %175 }
 0x104   :  { %v210_v10 = vmul.f32 0.0051020407, %v168_v58  ;;  %v212_v42 = vmul.f32 0.0051020407, %v176_v37  ;;  %v184_v38 = vpop.xlane.xlu2 %183 }
 0x105   :  { %v604_v44 = vpop.eup %603  ;;  %v214_v39 = vmul.f32 0.0051020407, %v184_v38 }
 0x106   :  { %v606_v13 = vpop.eup %605  ;;  %v254_v1 = vmul.f32 %v604_v44, %v223_v47  ;;  %v997_v17 = vadd.f32 1e-05, %v210_v10  ;;  %v999_v2 = vadd.f32 1e-05, %v212_v42  ;;  %vm260_vm2 = vweird.f32 %v604_v44 }
 0x107   :  { %v234_v3 = vmul.f32 %v606_v13, %v221_v48  ;;  %v1001_v25 = vadd.f32 1e-05, %v214_v39  ;;  %vm240_vm3 = vweird.f32 %v606_v13  ;;  %vm1024_vm4 = vmor %vm259_vm1, %vm260_vm2 }
 0x108   :  { %v255_v40 = vmul.f32 %v604_v44, %v254_v1  ;;  %607 = vrsqrt.f32 %v997_v17  ;;  %vm241_vm6 = vmor %vm239_vm5, %vm240_vm3  ;;  %vm269_vm8 = vweird.f32 %v999_v2  ;;  %vm249_vm10 = vweird.f32 %v997_v17 }
 0x109   :  { %v235_v11 = vmul.f32 %v606_v13, %v234_v3  ;;  %609 = vrsqrt.f32 %v999_v2  ;;  %vm289_vm13 = vweird.f32 %v1001_v25 }
 0x10a   :  { %v256_v16 = vmul.f32 0.5, %v255_v40  ;;  %611 = vrsqrt.f32 %v1001_v25 }
 0x10b   :  { %v236_v14 = vmul.f32 0.5, %v235_v11  ;;  %v180_v20 = vpop.xlane.xlu1 %179  ;;  %v188_v46 = vpop.xlane.xlu0 %187 }
 0x10c   :  { %v257_v58 = vsub.f32 1.5, %v256_v16  ;;  %v213_v37 = vmul.f32 0.0051020407, %v180_v20  ;;  %v215_v10 = vmul.f32 0.0051020407, %v188_v46  ;;  %v196_v42 = vpop.xlane.xlu2 %195 }
 0x10d   :  { %v237_v38 = vsub.f32 1.5, %v236_v14  ;;  %v217_v39 = vmul.f32 0.0051020407, %v196_v42 }
 0x10e   :  { %v1006_v0 = vpop.eup %607  ;;  %v1008_v1 = vadd.f32 1e-05, %v213_v37  ;;  %v1010_v3 = vadd.f32 1e-05, %v215_v10  ;;  %v258_v20 = vmul.f32 %v604_v44, %v257_v58 }
 0x10f   :  { %v1012_v40 = vpop.eup %609  ;;  %v244_v11 = vmul.f32 %v1006_v0, %v997_v17  ;;  %v1016_v16 = vadd.f32 1e-05, %v217_v39  ;;  %v238_v46 = vmul.f32 %v606_v13, %v237_v38  ;;  %vm250_vm7 = vweird.f32 %v1006_v0 }
 0x110   :  { %v1018_v62 = vpop.eup %611  ;;  %v264_v14 = vmul.f32 %v1012_v40, %v999_v2  ;;  %613 = vrsqrt.f32 %v1008_v1  ;;  %v262_v48 = vsel %vm1024_vm4, %v604_v44, %v258_v20  ;;  %vm270_vm9 = vweird.f32 %v1012_v40  ;;  %vm1067_vm11 = vmor %vm249_vm10, %vm250_vm7 }
 0x111   :  { %v245_v10 = vmul.f32 %v1006_v0, %v244_v11  ;;  %v284_v42 = vmul.f32 %v1018_v62, %v1001_v25  ;;  %615 = vrsqrt.f32 %v1010_v3  ;;  %v242_v11 = vsel %vm241_vm6, %v606_v13, %v238_v46  ;;  %vm271_vm12 = vmor %vm269_vm8, %vm270_vm9 }
 0x112   :  { %v265_v58 = vmul.f32 %v1012_v40, %v264_v14  ;;  %617 = vrsqrt.f32 %v1016_v16  ;;  %v367_v12 = vmul.f32 %v807_v51, %v262_v48  ;;  %v365_v5 = vmul.f32 %v802_v50, %v242_v11 }
 0x113   :  { %v246_v38 = vmul.f32 0.5, %v245_v10  ;;  %v285_v47 = vmul.f32 %v1018_v62, %v284_v42  ;;  %v192_v39 = vpop.xlane.xlu1 %191  ;;  %v200_v61 = vpop.xlane.xlu0 %199  ;;  %vm290_vm14 = vweird.f32 %v1018_v62  ;;  %vm279_vm2 = vweird.f32 %v1008_v1 }
 0x114   :  { %v266_v60 = vmul.f32 0.5, %v265_v58  ;;  %v216_v59 = vmul.f32 0.0051020407, %v192_v39  ;;  %v218_v28 = vmul.f32 0.0051020407, %v200_v61  ;;  %v208_v7 = vpop.xlane.xlu2 %207  ;;  %389 = vperm.xlu2 %599, %v367_v12   ;;  %379 = vperm.xlu0 %597, %v365_v5   ;;  %vm1090_vm1 = vmor %vm289_vm13, %vm290_vm14  ;;  %vm319_vm4 = vweird.f32 %v1016_v16 }
 0x115   :  { %v220_v14 = vmul.f32 0.0051020407, %v208_v7  ;;  %v286_v10 = vmul.f32 0.5, %v285_v47  ;;  %v247_v44 = vsub.f32 1.5, %v246_v38  ;;  %vm299_vm7 = vweird.f32 %v1010_v3 }
 0x116   :  { %v1040_v19 = vpop.eup %613  ;;  %v1042_v31 = vadd.f32 1e-05, %v216_v59  ;;  %v1044_v42 = vadd.f32 1e-05, %v218_v28  ;;  %v267_v13 = vsub.f32 1.5, %v266_v60 }
 0x117   :  { %v1046_v37 = vpop.eup %615  ;;  %v274_v61 = vmul.f32 %v1040_v19, %v1008_v1  ;;  %v1050_v51 = vadd.f32 1e-05, %v220_v14  ;;  %v287_v60 = vsub.f32 1.5, %v286_v10  ;;  %v248_v38 = vmul.f32 %v1006_v0, %v247_v44 }
 0x118   :  { %v1052_v50 = vpop.eup %617  ;;  %v294_v28 = vmul.f32 %v1046_v37, %v1010_v3  ;;  %619 = vrsqrt.f32 %v1042_v31  ;;  %v268_v47 = vmul.f32 %v1012_v40, %v267_v13  ;;  %vm280_vm15 = vweird.f32 %v1040_v19 }
 0x119   :  { %v275_v59 = vmul.f32 %v1040_v19, %v274_v61  ;;  %v314_v5 = vmul.f32 %v1052_v50, %v1016_v16  ;;  %621 = vrsqrt.f32 %v1044_v42  ;;  %v252_v11 = vsel %vm1067_vm11, %v1006_v0, %v248_v38  ;;  %vm1101_vm3 = vmor %vm279_vm2, %vm280_vm15 }
 0x11a   :  { %v295_v12 = vmul.f32 %v1046_v37, %v294_v28  ;;  %623 = vrsqrt.f32 %v1050_v51  ;;  %v272_v14 = vsel %vm271_vm12, %v1012_v40, %v268_v47  ;;  %v366_v2 = vmul.f32 %v796_v49, %v252_v11 }
 0x11b   :  { %v276_v20 = vmul.f32 0.5, %v275_v59  ;;  %v315_v46 = vmul.f32 %v1052_v50, %v314_v5  ;;  %v204_v58 = vpop.xlane.xlu1 %203  ;;  %v368_v25 = vmul.f32 %v820_v53, %v272_v14  ;;  %v288_v13 = vmul.f32 %v1018_v62, %v287_v60 }
 0x11c   :  { %v219_v17 = vmul.f32 0.0051020407, %v204_v58  ;;  %v296_v0 = vmul.f32 0.5, %v295_v12  ;;  %384 = vperm.xlu1 %598, %v366_v2   ;;  %vm320_vm5 = vweird.f32 %v1052_v50  ;;  %vm300_vm8 = vweird.f32 %v1046_v37 }
 0x11d   :  { %v277_v39 = vsub.f32 1.5, %v276_v20  ;;  %v316_v48 = vmul.f32 0.5, %v315_v46  ;;  %394 = vperm.xlu2 %599, %v368_v25   ;;  %v292_v20 = vsel %vm1090_vm1, %v1018_v62, %v288_v13  ;;  %vm1129_vm9 = vmor %vm319_vm4, %vm320_vm5  ;;  %vm309_vm10 = vweird.f32 %v1042_v31 }
 0x11e   :  { %v620_v10 = vpop.eup %619  ;;  %v1083_v44 = vadd.f32 1e-05, %v219_v17  ;;  %v297_v46 = vsub.f32 1.5, %v296_v0  ;;  %vm301_vm12 = vmor %vm299_vm7, %vm300_vm8  ;;  %vm349_vm13 = vweird.f32 %v1050_v51  ;;  %vm329_vm1 = vweird.f32 %v1044_v42 }
 0x11f   :  { %v1088_v61 = vpop.eup %621  ;;  %v304_v40 = vmul.f32 %v620_v10, %v1042_v31  ;;  %v278_v59 = vmul.f32 %v1040_v19, %v277_v39  ;;  %v317_v1 = vsub.f32 1.5, %v316_v48  ;;  %v370_v39 = vmul.f32 %v832_v55, %v292_v20 }
 0x120   :  { %v1097_v5 = vpop.eup %623  ;;  %v324_v53 = vmul.f32 %v1088_v61, %v1044_v42  ;;  %625 = vrsqrt.f32 %v1083_v44  ;;  %vm310_vm6 = vweird.f32 %v620_v10  ;;  %v298_v25 = vmul.f32 %v1046_v37, %v297_v46 }
 0x121   :  { %v305_v60 = vmul.f32 %v620_v10, %v304_v40  ;;  %v344_v12 = vmul.f32 %v1097_v5, %v1050_v51  ;;  %v282_v7 = vsel %vm1101_vm3, %v1040_v19, %v278_v59  ;;  %v318_v11 = vmul.f32 %v1052_v50, %v317_v1  ;;  %vm311_vm11 = vmor %vm309_vm10, %vm310_vm6 }
 0x122   :  { %v325_v38 = vmul.f32 %v1088_v61, %v324_v53  ;;  %v369_v17 = vmul.f32 %v825_v54, %v282_v7  ;;  %vm350_vm14 = vweird.f32 %v1097_v5  ;;  %v302_v49 = vsel %vm301_vm12, %v1046_v37, %v298_v25 }
 0x123   :  { %v306_v58 = vmul.f32 0.5, %v305_v60  ;;  %v345_v47 = vmul.f32 %v1097_v5, %v344_v12  ;;  %v322_v16 = vsel %vm1129_vm9, %v1052_v50, %v318_v11  ;;  %vm1148_vm2 = vmor %vm349_vm13, %vm350_vm14  ;;  %vm330_vm3 = vweird.f32 %v1088_v61  ;;  %v362_v12 = vld [vmem:[%s1233_s1 + $0x48] sm:$0xff] }
 0x124   :  { %v326_v54 = vmul.f32 0.5, %v325_v38  ;;  %399 = vperm.xlu1 %598, %v369_v17   ;;  %vm339_vm4 = vweird.f32 %v1083_v44  ;;  %vm331_vm6 = vmor %vm329_vm1, %vm330_vm3  ;;  %v1269_v46 = vmov 1  }
 0x125   :  { %v307_v48 = vsub.f32 1.5, %v306_v58  ;;  %v346_v19 = vmul.f32 0.5, %v345_v47  ;;  %404 = vperm.xlu2 %599, %v370_v39  }
 0x126   :  { %v626_v14 = vpop.eup %625  ;;  %v327_v40 = vsub.f32 1.5, %v326_v54 }
 0x127   :  { %v334_v55 = vmul.f32 %v626_v14, %v1083_v44  ;;  %v308_v2 = vmul.f32 %v620_v10, %v307_v48  ;;  %v347_v13 = vsub.f32 1.5, %v346_v19  ;;  %vm340_vm15 = vweird.f32 %v626_v14 }
 0x128   :  { %v328_v51 = vmul.f32 %v1088_v61, %v327_v40  ;;  %vm341_vm5 = vmor %vm339_vm4, %vm340_vm15 }
 0x129   :  { %v335_v28 = vmul.f32 %v626_v14, %v334_v55  ;;  %v312_v0 = vsel %vm311_vm11, %v620_v10, %v308_v2  ;;  %v373_v10 = vmul.f32 %v844_v57, %v322_v16  ;;  %v348_v50 = vmul.f32 %v1097_v5, %v347_v13  ;;  %v363_v57 = vld [vmem:[%s1233_s1 + $0x50] sm:$0xff] }
 0x12a   :  { %v372_v31 = vmul.f32 %v837_v56, %v312_v0  ;;  %v371_v56 = vmul.f32 %v814_v52, %v302_v49  ;;  %v364_v52 = vld [vmem:[%s1233_s1 + $0x58] sm:$0xff]  ;;  %v332_v60 = vsel %vm331_vm6, %v1088_v61, %v328_v51  ;;  %v1275_v51 = vld [vmem:[#allocation10_spill] sm:$0xff]  ;;  %s684_s1 = smov [#allocation5]  }
 0x12b   :  { %v336_v59 = vmul.f32 0.5, %v335_v28  ;;  %v352_v1 = vsel %vm1148_vm2, %v1097_v5, %v348_v50  ;;  %v374_v20 = vmul.f32 %v362_v12, %v332_v60  ;;  %v1276_v60 = vld [vmem:[#allocation11_spill] sm:$0xff]  ;;  %s573_s11 = sshll.u32 %s684_s1, 4  ;;  %s574_s11 = int_to_ptr.vmem [resolvable:$true] %s573_s11 }
 0x12c   :  { %414 = vperm.xlu0 %597, %v372_v31   ;;  %409 = vperm.xlu1 %598, %v371_v56   ;;  %v376_v7 = vmul.f32 %v364_v52, %v352_v1 }
 0x12d   :  { %v337_v53 = vsub.f32 1.5, %v336_v59  ;;  %419 = vperm.xlu2 %599, %v373_v10   ;;  %v1271_v10 = vld [vmem:[#allocation8_spill] sm:$0xff] }
 0x12f   :  { %v338_v37 = vmul.f32 %v626_v14, %v337_v53  ;;  %v1272_v53 = vld [vmem:[#allocation9_spill] sm:$0xff] }
 0x131   :  { %v342_v42 = vsel %vm341_vm5, %v626_v14, %v338_v37  ;;  %v1274_v37 = vld [vmem:[#allocation15_spill] sm:$0xff] }
 0x132   :  { %v375_v44 = vmul.f32 %v363_v57, %v342_v42 }
 0x134   :  { %429 = vperm.xlu0 %597, %v375_v44   ;;  %424 = vperm.xlu1 %598, %v374_v20  }
 0x135   :  { %434 = vperm.xlu2 %599, %v376_v7   ;;  %v1277_v7 = vld [vmem:[#allocation12_spill] sm:$0xff] }
 0x13c   :  { %600 = vset.pattern.permute.xlu0 %v1269_v46  ;;  %602 = vset.pattern.permute.xlu1 %v1269_v46 }
 0x13d   :  { %508 = vperm.xlu0 %600, %v362_v12   ;;  %601 = vset.pattern.permute.xlu2 %v1269_v46 }
 0x13e   :  { %518 = vperm.xlu1 %602, %v364_v52   ;;  %513 = vperm.xlu2 %601, %v363_v57  }
 0x16e   :  { %v390_v5 = vpop.permute.xlu2 %389 }
 0x16f   :  { %v441_v61 = vmul.f32 %v390_v5, %v848_v63  ;;  %v442_v58 = vmul.f32 %v390_v5, %v851_v4 }
 0x171   :  { %v525_v38 = vadd.f32 %v981_v30, %v441_v61  ;;  %v526_v47 = vadd.f32 %v981_v30, %v442_v58  ;;  %v1278_v58 = vld [vmem:[#allocation13_spill] sm:$0xff] }
 0x173   :  { %549 = vst [vmem:[#allocation5 + $0x20] sm:$0xff] %v525_v38 }
 0x174   :  { %550 = vst.msk [vmem:[#allocation5 + $0x28] sm:$0xff] %vm52_vm0, %v526_v47  ;;  %v1279_v47 = vld [vmem:[#allocation14_spill] sm:$0xff] }
 0x177   :  { %v395_v17 = vpop.permute.xlu2 %394 }
 0x178   :  { %v443_v39 = vmul.f32 %v395_v17, %v873_v34  ;;  %v444_v48 = vmul.f32 %v395_v17, %v876_v35 }
 0x17a   :  { %v527_v19 = vadd.f32 %v983_v26, %v443_v39  ;;  %v528_v11 = vadd.f32 %v983_v26, %v444_v48 }
 0x17c   :  { %551 = vst [vmem:[#allocation5 + $0x30] sm:$0xff] %v527_v19 }
 0x17d   :  { %552 = vst.msk [vmem:[#allocation5 + $0x38] sm:$0xff] %vm52_vm0, %v528_v11 }
 0x17f   :  { %v405_v63 = vpop.permute.xlu2 %404 }
 0x180   :  { %v447_v4 = vmul.f32 %v405_v63, %v885_v43  ;;  %v448_v30 = vmul.f32 %v405_v63, %v888_v45 }
 0x182   :  { %v531_v14 = vadd.f32 %v989_v29, %v447_v4  ;;  %v532_v62 = vadd.f32 %v989_v29, %v448_v30 }
 0x184   :  { %555 = vst [vmem:[#allocation5 + $0x50] sm:$0xff] %v531_v14 }
 0x185   :  { %556 = vst.msk [vmem:[#allocation5 + $0x58] sm:$0xff] %vm52_vm0, %v532_v62 }
 0x186   :  { %v380_v34 = vpop.permute.xlu0 %379 }
 0x187   :  { %v420_v35 = vpop.permute.xlu2 %419  ;;  %v437_v54 = vmul.f32 %v380_v34, %v854_v8  ;;  %v438_v26 = vmul.f32 %v380_v34, %v857_v9 }
 0x188   :  { %v453_v55 = vmul.f32 %v420_v35, %v923_v21  ;;  %v454_v2 = vmul.f32 %v420_v35, %v926_v22 }
 0x189   :  { %v521_v43 = vadd.f32 %v979_v23, %v437_v54  ;;  %v522_v29 = vadd.f32 %v979_v23, %v438_v26 }
 0x18a   :  { %v537_v45 = vadd.f32 %v995_v18, %v453_v55  ;;  %v538_v25 = vadd.f32 %v995_v18, %v454_v2 }
 0x18b   :  { %545 = vst [vmem:[#allocation5] sm:$0xff] %v521_v43 }
 0x18c   :  { %561 = vst [vmem:[#allocation5 + $0x80] sm:$0xff] %v537_v45 }
 0x18d   :  { %562 = vst.msk [vmem:[#allocation5 + $0x88] sm:$0xff] %vm52_vm0, %v538_v25 }
 0x18e   :  { %546 = vst.msk [vmem:[#allocation5 + $0x8] sm:$0xff] %vm52_vm0, %v522_v29  ;;  %v385_v8 = vpop.permute.xlu1 %384 }
 0x18f   :  { %v439_v9 = vmul.f32 %v385_v8, %v879_v36  ;;  %v440_v21 = vmul.f32 %v385_v8, %v882_v41  ;;  %v435_v31 = vpop.permute.xlu2 %434 }
 0x190   :  { %v459_v38 = vmul.f32 %v435_v31, %v1278_v58  ;;  %v460_v17 = vmul.f32 %v435_v31, %v1279_v47 }
 0x191   :  { %v523_v22 = vadd.f32 %v987_v27, %v439_v9  ;;  %v524_v13 = vadd.f32 %v987_v27, %v440_v21  ;;  %v1270_v27 = vld [vmem:[#allocation16_spill] sm:$0xff] }
 0x193   :  { %547 = vst [vmem:[#allocation5 + $0x10] sm:$0xff] %v523_v22 }
 0x194   :  { %548 = vst.msk [vmem:[#allocation5 + $0x18] sm:$0xff] %vm52_vm0, %v524_v13 }
 0x196   :  { %v400_v18 = vpop.permute.xlu1 %399 }
 0x197   :  { %v445_v23 = vmul.f32 %v400_v18, %v903_v15  ;;  %v446_v28 = vmul.f32 %v400_v18, %v870_v33 }
 0x199   :  { %v529_v0 = vadd.f32 %v985_v32, %v445_v23  ;;  %v530_v16 = vadd.f32 %v985_v32, %v446_v28  ;;  %v1273_v32 = vld [vmem:[#allocation17_spill] sm:$0xff] }
 0x19b   :  { %553 = vst [vmem:[#allocation5 + $0x40] sm:$0xff] %v529_v0 }
 0x19c   :  { %554 = vst.msk [vmem:[#allocation5 + $0x48] sm:$0xff] %vm52_vm0, %v530_v16 }
 0x19e   :  { %v415_v36 = vpop.permute.xlu0 %414  ;;  %v410_v15 = vpop.permute.xlu1 %409 }
 0x19f   :  { %v451_v41 = vmul.f32 %v415_v36, %v937_v24  ;;  %v452_v40 = vmul.f32 %v415_v36, %v911_v6  ;;  %v449_v33 = vmul.f32 %v410_v15, %v1271_v10  ;;  %v450_v50 = vmul.f32 %v410_v15, %v1272_v53  ;;  %v514_v6 = vpop.permute.xlu2 %513 }
 0x1a1   :  { %v535_v59 = vadd.f32 %v1270_v27, %v451_v41  ;;  %v536_v49 = vadd.f32 %v1270_v27, %v452_v40  ;;  %v533_v3 = vadd.f32 %v1273_v32, %v449_v33  ;;  %v534_v24 = vadd.f32 %v1273_v32, %v450_v50 }
 0x1a3   :  { %559 = vst [vmem:[#allocation5 + $0x70] sm:$0xff] %v535_v59 }
 0x1a4   :  { %560 = vst.msk [vmem:[#allocation5 + $0x78] sm:$0xff] %vm52_vm0, %v536_v49 }
 0x1a5   :  { %557 = vst [vmem:[#allocation5 + $0x60] sm:$0xff] %v533_v3 }
 0x1a6   :  { %v430_v56 = vpop.permute.xlu0 %429  ;;  %558 = vst.msk [vmem:[#allocation5 + $0x68] sm:$0xff] %vm52_vm0, %v534_v24  ;;  %v425_v44 = vpop.permute.xlu1 %424 }
 0x1a7   :  { %v457_v57 = vmul.f32 %v430_v56, %v1274_v37  ;;  %v458_v42 = vmul.f32 %v430_v56, %v1275_v51  ;;  %v455_v12 = vmul.f32 %v425_v44, %v1276_v60  ;;  %v456_v20 = vmul.f32 %v425_v44, %v1277_v7 }
 0x1a9   :  { %v541_v1 = vadd.f32 %v514_v6, %v457_v57  ;;  %v542_v52 = vadd.f32 %v514_v6, %v458_v42 }
 0x1ab   :  { %565 = vst [vmem:[#allocation5 + $0xa0] sm:$0xff] %v541_v1 }
 0x1ac   :  { %566 = vst.msk [vmem:[#allocation5 + $0xa8] sm:$0xff] %vm52_vm0, %v542_v52 }
 0x1af   :  { %v509_v46 = vpop.permute.xlu0 %508 }
 0x1b0   :  { %v539_v5 = vadd.f32 %v509_v46, %v455_v12  ;;  %v540_v61 = vadd.f32 %v509_v46, %v456_v20  ;;  %v519_v39 = vpop.permute.xlu1 %518 }
 0x1b1   :  { %v543_v48 = vadd.f32 %v519_v39, %v459_v38  ;;  %v544_v19 = vadd.f32 %v519_v39, %v460_v17 }
 0x1b2   :  { %563 = vst [vmem:[#allocation5 + $0x90] sm:$0xff] %v539_v5 }
 0x1b3   :  { %564 = vst.msk [vmem:[#allocation5 + $0x98] sm:$0xff] %vm52_vm0, %v540_v61 }
 0x1b4   :  { %567 = vst [vmem:[#allocation5 + $0xb0] sm:$0xff] %v543_v48 }
 0x1b5   :  { %568 = vst.msk [vmem:[#allocation5 + $0xb8] sm:$0xff] %vm52_vm0, %v544_v19 }
 0x1b6   :  { %581 = dma.vmem_to_hbm [thread:$0]  %s574_s11, 3072, %s576_s0, [#allocation4], %s680_s14, %s680_s14, %s681_s15  }
 0x1b7   :  { %677 = dma.done.wait [#allocation4], 3072  }
 0x1b8   :  { %678 = vsyncadd [#allocation4], 4294964224 }
 0x1b9   :  { %586 = vsyncpa [#allocation3], 1 }
 0x1ba   :  { %587 = vsyncpa [#allocation4], 1 }

</bundles_post_ra>
